<compile_context>
chip_gen: v7x
topology: tpu7x:2x2x1
jax: 0.10.0
libtpu: 0.0.40
codegen_flags: <defaults>
</compile_context>

<pallas_src>
import jax
import jax.numpy as jnp
from jax.experimental import pallas as pl
from jax.experimental.pallas import tpu as pltpu


# ----------------------- fused LM-head cloze kernel -----------------------
def _cloze_head_kernel(h_ref, w_ref, b_ref,        # inputs  (VMEM tiles)
                       row_ref, lse_ref,           # outputs
                       m_ref, s_ref):              # scratch (online LSE)
    v = pl.program_id(1)                           # vocab tile within shard
    nv = pl.num_programs(1)

    @pl.when(v == 0)
    def _init():
        m_ref[...] = jnp.full_like(m_ref, -jnp.inf)
        s_ref[...] = jnp.zeros_like(s_ref)

    # Single [B, H] @ [H, tv] MXU matmul per grid step (hidden axis collapsed),
    # bf16 inputs with f32 accumulation; bias added in f32.
    logits = jnp.dot(h_ref[...], w_ref[...],
                     preferred_element_type=jnp.float32) + b_ref[...]
    row_ref[...] = logits                          # lane-dense [B, tv] store

    # Online logsumexp across this shard's vocab tiles.
    tile_max = jnp.max(logits, axis=-1, keepdims=True)        # [B, 1]
    m_new = jnp.maximum(m_ref[...], tile_max)
    s_ref[...] = (s_ref[...] * jnp.exp(m_ref[...] - m_new)
                  + jnp.sum(jnp.exp(logits - m_new), axis=-1, keepdims=True))
    m_ref[...] = m_new

    @pl.when(v == nv - 1)
    def _emit_partial_lse():
        # Per-shard partial logsumexp; shards are combined in the wrapper so
        # the shard axis can be "parallel" (v7x megacore).
        lse_ref[...] = (m_ref[...] + jnp.log(s_ref[...]))[None]


# ------------------------------ tiling plan -------------------------------
def _vmem_plan():
    """VMEM budget/limit derived from the detected chip (safe on v7x's 64 MiB,
    large on v5e/v6e's 128 MiB)."""
    try:
        phys = getattr(pltpu.get_tpu_info(), "vmem_capacity_bytes", None)
    except Exception:                                  # pragma: no cover
        phys = None
    if not phys:
        phys = 64 * 1024 * 1024                        # conservative (v7x)
    limit = min((phys * 3) // 4, 96 * 1024 * 1024)     # scoped VMEM limit
    budget = (limit * 2) // 3                          # vocab-streamed buffers
    return int(budget), int(limit)


def _pick_vocab_tile(Vp, H, B, budget_bytes):
    """Largest 128-multiple vocab tile dividing Vp whose double-buffered
    streams (bf16 weights + f32 logit row + f32 bias) fit the VMEM budget."""
    per_col = 2 * (H * 2 + B * 4 + 4)                  # 2 pipeline buffers
    tv_max = max(128, (budget_bytes // per_col) // 128 * 128)
    tv_max = min(tv_max, Vp)
    for cand in range(tv_max, 127, -128):
        if Vp % cand == 0:
            return cand
    return 128


# ------------------------------- wrapper -----------------------------------
def fused_cloze_head(h_cloze, w_head, b_head, *, tv=None,
                     vmem_budget_bytes=None, vmem_limit_bytes=None):
    """[B, H] cloze hidden states -> (logit row [B, V] f32, lse [B, 1] f32)."""
    B, H = h_cloze.shape
    V = w_head.shape[1]

    auto_budget, auto_limit = _vmem_plan()
    if vmem_budget_bytes is None:
        vmem_budget_bytes = auto_budget
    if vmem_limit_bytes is None:
        vmem_limit_bytes = auto_limit

    # LM-head weights should be stored persistently in bf16; casting here
    # would add an extra [H, V] HBM pass per call (kept only as a fallback).
    # TODO(synk): int8 (v5e/v6e) / fp8 (v7x) weight quantization to halve the
    # dominant H*V weight stream.
    if w_head.dtype != jnp.bfloat16:
        w_head = w_head.astype(jnp.bfloat16)
    h_bf = h_cloze.astype(jnp.bfloat16)                # tiny [B, H] cast
    bias = jnp.asarray(b_head, jnp.float32).reshape(1, V)

    # Fallback only: pad vocab to a multiple of 128 (Megatron/GLM vocabs are
    # already 128-padded). Padded columns get a very negative bias so they
    # vanish from the logsumexp; the logit row is sliced back to V below.
    Vp = ((V + 127) // 128) * 128
    if Vp != V:
        w_head = jnp.pad(w_head, ((0, 0), (0, Vp - V)))
        bias = jnp.pad(bias, ((0, 0), (0, Vp - V)), constant_values=-1e30)

    if tv is None:
        tv = _pick_vocab_tile(Vp, H, B, vmem_budget_bytes)
    tv = min(tv, Vp)
    assert Vp % tv == 0, "vocab tile must divide the (128-padded) vocab"

    nv = Vp // tv
    # Vocab shards: leading "parallel" grid axis. On v7x each TensorCore takes
    # half the vocab; on v5e/v6e it is just a sequential outer loop.
    nshard = 2 if nv % 2 == 0 else 1
    nv_inner = nv // nshard

    cost = pl.CostEstimate(
        flops=2 * B * H * Vp,
        transcendentals=B * Vp,
        bytes_accessed=(H * Vp * 2 + B * H * 2 + Vp * 4
                        + B * Vp * 4 + nshard * B * 4),
    )

    row_logits, lse_parts = pl.pallas_call(
        _cloze_head_kernel,
        out_shape=(
            jax.ShapeDtypeStruct((B, Vp), jnp.float32),         # logit row
            jax.ShapeDtypeStruct((nshard, B, 1), jnp.float32),  # per-shard LSE
        ),
        grid_spec=pltpu.PrefetchScalarGridSpec(
            num_scalar_prefetch=0,
            grid=(nshard, nv_inner),
            in_specs=[
                # whole cloze hidden block stays VMEM-resident
                pl.BlockSpec((B, H), lambda s, v: (0, 0)),
                # bf16 weight tile streamed over the vocab
                pl.BlockSpec((H, tv), lambda s, v: (0, s * nv_inner + v)),
                # f32 bias tile
                pl.BlockSpec((1, tv), lambda s, v: (0, s * nv_inner + v)),
            ],
            out_specs=[
                pl.BlockSpec((B, tv), lambda s, v: (0, s * nv_inner + v)),
                pl.BlockSpec((1, B, 1), lambda s, v: (s, 0, 0)),
            ],
            scratch_shapes=[
                pltpu.VMEM((B, 1), jnp.float32),   # running max
                pltpu.VMEM((B, 1), jnp.float32),   # running sum-exp
            ],
        ),
        compiler_params=pltpu.CompilerParams(
            dimension_semantics=("parallel", "arbitrary"),
            vmem_limit_bytes=int(vmem_limit_bytes),
        ),
        cost_estimate=cost,
    )(h_bf, w_head, bias)

    lse = jax.nn.logsumexp(lse_parts[:, :, 0], axis=0)[:, None]   # [B, 1]
    if Vp != V:
        row_logits = row_logits[:, :V]
    return row_logits, lse


# --------------- GLMForSingleTokenCloze.forward equivalent ---------------
def glm_single_token_cloze_forward(params, input_ids, position_ids,
                                   attention_mask, target_ids, *, tv=None,
                                   vmem_budget_bytes=None,
                                   vmem_limit_bytes=None):
    # TODO(synk): the full GLM transformer backbone (self.model +
    # build_mask_matrix) is not reproducible here; a deterministic embedding
    # stands in for it. The cloze head / loss logic matches PyTorch exactly.
    wte, wpe, w_head, b_head = params
    hidden = wte[input_ids] + wpe[position_ids]                  # [B, S, H]
    B = hidden.shape[0]
    C = target_ids.shape[1]
    V = w_head.shape[1]

    # Gather the single cloze-position hidden state BEFORE the LM head:
    # only one row per batch element is ever used downstream.
    h_cloze = hidden[jnp.arange(B), attention_mask]              # [B, H]

    row_logits, lse = fused_cloze_head(
        h_cloze, w_head, b_head, tv=tv,
        vmem_budget_bytes=vmem_budget_bytes,
        vmem_limit_bytes=vmem_limit_bytes)

    # output = -vocab_parallel_cross_entropy(target_logits, target_ids)
    output = (jnp.take_along_axis(row_logits, target_ids.astype(jnp.int32),
                                  axis=-1) - lse)                # [B, C]

    # PyTorch-module parity: logits repeated over choices. Callers that do
    # not need the materialized [B, C, V] copy should consume row_logits
    # directly (avoids a C-fold B*V HBM writeback).
    target_logits = jnp.broadcast_to(row_logits[:, None, :], (B, C, V))
    return output, target_logits


if __name__ == "__main__":
    B, S, H, V, C = 2, 8, 256, 1024, 2
    key = jax.random.PRNGKey(0)
    k1, k2, k3, k4, k5, k6 = jax.random.split(key, 6)

    # Backbone stand-in params in f32; LM head stored persistently in bf16
    # (per perf review: no per-call f32->bf16 weight cast).
    wte = 0.02 * jax.random.normal(k1, (V, H), jnp.float32)
    wpe = 0.02 * jax.random.normal(k2, (S, H), jnp.float32)
    w_head = (0.02 * jax.random.normal(k3, (H, V), jnp.float32)
              ).astype(jnp.bfloat16)
    b_head = 0.01 * jax.random.normal(k6, (V,), jnp.float32)
    params = (wte, wpe, w_head, b_head)

    # deterministic example inputs
    input_ids = jax.random.randint(k4, (B, S), 0, V, jnp.int32)
    position_ids = jnp.broadcast_to(jnp.arange(S, dtype=jnp.int32), (B, S))
    attention_mask = jnp.array([3, 5], dtype=jnp.int32)   # per-sample cloze pos
    target_ids = jax.random.randint(k5, (B, C), 0, V, jnp.int32)

    # Small explicit tile -> exercises multiple vocab tiles and the two-shard
    # partial-LSE combine.
    out_small, tl_small = glm_single_token_cloze_forward(
        params, input_ids, position_ids, attention_mask, target_ids, tv=128)
    # Default (VMEM-budget-derived) tiling -> single large vocab tile here.
    out_big, tl_big = glm_single_token_cloze_forward(
        params, input_ids, position_ids, attention_mask, target_ids)
    jax.block_until_ready((out_small, tl_small, out_big, tl_big))

    # pure-JAX reference (same bf16 head matmul path, f32 accumulation)
    hidden = wte[input_ids] + wpe[position_ids]
    h_cloze = hidden[jnp.arange(B), attention_mask]
    row_ref = (jnp.dot(h_cloze.astype(jnp.bfloat16), w_head,
                       preferred_element_type=jnp.float32)
               + b_head.astype(jnp.float32)[None, :])
    lse_ref = jax.nn.logsumexp(row_ref, axis=-1, keepdims=True)
    out_ref = jnp.take_along_axis(row_ref, target_ids, axis=-1) - lse_ref
    tl_ref = jnp.broadcast_to(row_ref[:, None, :], (B, C, V))

    assert jnp.allclose(out_small, out_ref, atol=2e-3, rtol=2e-3)
    assert jnp.allclose(tl_small, tl_ref, atol=2e-3, rtol=2e-3)
    assert jnp.allclose(out_big, out_ref, atol=2e-3, rtol=2e-3)
    assert jnp.allclose(tl_big, tl_ref, atol=2e-3, rtol=2e-3)

    print("KERNEL_OK")
</pallas_src>

<mosaic_0001>
module attributes {stable_mosaic.version = 11 : i64} {
  func.func @_cloze_head_kernel(%arg0: i32, %arg1: i32, %arg2: memref<2x256xbf16, #tpu.memory_space<vmem>>, %arg3: memref<256x128xbf16, #tpu.memory_space<vmem>>, %arg4: memref<1x128xf32, #tpu.memory_space<vmem>>, %arg5: memref<2x128xf32, #tpu.memory_space<vmem>>, %arg6: memref<1x2x1xf32, #tpu.memory_space<vmem>>, %arg7: memref<2x1xf32, #tpu.memory_space<vmem>>, %arg8: memref<2x1xf32, #tpu.memory_space<vmem>>) attributes {dimension_semantics = [#tpu.dimension_semantics<parallel>, #tpu.dimension_semantics<arbitrary>], iteration_bounds = array<i64: 2, 4>, scalar_prefetch = 0 : i64, scratch_operands = 2 : i64, tpu.core_type = #tpu.core_type<tc>, window_params = [{pipeline_mode = #tpu.pipeline_mode<synchronous>, transform_indices = @transform_0, window_bounds = array<i64: 2, 256>}, {transform_indices = @transform_1, window_bounds = array<i64: 256, 128>}, {transform_indices = @transform_2, window_bounds = array<i64: 1, 128>}, {transform_indices = @transform_3, window_bounds = array<i64: 2, 128>}, {transform_indices = @transform_4, window_bounds = array<i64: 1, 2, 1>}]} {
    %c0_i32 = arith.constant 0 : i32
    %0 = arith.cmpi eq, %arg1, %c0_i32 : i32
    %1 = arith.extui %0 : i1 to i32
    %c0_i32_0 = arith.constant 0 : i32
    %2 = arith.cmpi ne, %1, %c0_i32_0 : i32
    scf.if %2 {
      %cst_21 = arith.constant 0xFF800000 : f32
      %30 = vector.broadcast %cst_21 : f32 to vector<2x1xf32>
      %c0_22 = arith.constant 0 : index
      %c0_23 = arith.constant 0 : index
      %31 = vector.load %arg7[%c0_22, %c0_23] : memref<2x1xf32, #tpu.memory_space<vmem>>, vector<2x1xf32>
      tpu.vector_store %arg7[%c0_22, %c0_23], %30 {strides = array<i32>} : memref<2x1xf32, #tpu.memory_space<vmem>>, vector<2x1xf32>,
      %cst_24 = arith.constant 0.000000e+00 : f32
      %32 = vector.broadcast %cst_24 : f32 to vector<2x1xf32>
      %c0_25 = arith.constant 0 : index
      %c0_26 = arith.constant 0 : index
      %33 = vector.load %arg8[%c0_25, %c0_26] : memref<2x1xf32, #tpu.memory_space<vmem>>, vector<2x1xf32>
      tpu.vector_store %arg8[%c0_25, %c0_26], %32 {strides = array<i32>} : memref<2x1xf32, #tpu.memory_space<vmem>>, vector<2x1xf32>,
    } else {
    }
    %c0 = arith.constant 0 : index
    %c0_1 = arith.constant 0 : index
    %3 = vector.load %arg2[%c0, %c0_1] : memref<2x256xbf16, #tpu.memory_space<vmem>>, vector<2x256xbf16>
    %c0_2 = arith.constant 0 : index
    %c0_3 = arith.constant 0 : index
    %4 = vector.load %arg3[%c0_2, %c0_3] : memref<256x128xbf16, #tpu.memory_space<vmem>>, vector<256x128xbf16>
    %cst = arith.constant dense<0.000000e+00> : vector<2x128xf32>
    %5 = tpu.matmul %3, %4, %cst {dimension_numbers = #tpu.dot_dimension_numbers<[1], [0], [0], [1], [0, 0, 1, 1], [], []>} : vector<2x256xbf16>, vector<256x128xbf16>, vector<2x128xf32> -> vector<2x128xf32>
    %c0_4 = arith.constant 0 : index
    %c0_5 = arith.constant 0 : index
    %6 = vector.load %arg4[%c0_4, %c0_5] : memref<1x128xf32, #tpu.memory_space<vmem>>, vector<1x128xf32>
    %7 = vector.broadcast %6 : vector<1x128xf32> to vector<2x128xf32>
    %8 = arith.addf %5, %7 : vector<2x128xf32>
    %c0_6 = arith.constant 0 : index
    %c0_7 = arith.constant 0 : index
    %9 = vector.load %arg5[%c0_6, %c0_7] : memref<2x128xf32, #tpu.memory_space<vmem>>, vector<2x128xf32>
    tpu.vector_store %arg5[%c0_6, %c0_7], %8 {strides = array<i32>} : memref<2x128xf32, #tpu.memory_space<vmem>>, vector<2x128xf32>,
    %cst_8 = arith.constant dense<0xFF800000> : vector<2xf32>
    %10 = vector.multi_reduction <maximumf>, %8, %cst_8 [1] : vector<2x128xf32> to vector<2xf32>
    %11 = vector.shape_cast %10 : vector<2xf32> to vector<2x1xf32>
    %c0_9 = arith.constant 0 : index
    %c0_10 = arith.constant 0 : index
    %12 = vector.load %arg7[%c0_9, %c0_10] : memref<2x1xf32, #tpu.memory_space<vmem>>, vector<2x1xf32>
    %13 = arith.maximumf %12, %11 : vector<2x1xf32>
    %c0_11 = arith.constant 0 : index
    %c0_12 = arith.constant 0 : index
    %14 = vector.load %arg8[%c0_11, %c0_12] : memref<2x1xf32, #tpu.memory_space<vmem>>, vector<2x1xf32>
    %c0_13 = arith.constant 0 : index
    %c0_14 = arith.constant 0 : index
    %15 = vector.load %arg7[%c0_13, %c0_14] : memref<2x1xf32, #tpu.memory_space<vmem>>, vector<2x1xf32>
    %16 = arith.subf %15, %13 : vector<2x1xf32>
    %17 = math.exp %16 : vector<2x1xf32>
    %18 = arith.mulf %14, %17 : vector<2x1xf32>
    %19 = vector.broadcast %13 : vector<2x1xf32> to vector<2x128xf32>
    %20 = arith.subf %8, %19 : vector<2x128xf32>
    %21 = math.exp %20 : vector<2x128xf32>
    %cst_15 = arith.constant dense<0.000000e+00> : vector<2xf32>
    %22 = vector.multi_reduction <add>, %21, %cst_15 [1] : vector<2x128xf32> to vector<2xf32>
    %23 = vector.shape_cast %22 : vector<2xf32> to vector<2x1xf32>
    %24 = arith.addf %18, %23 : vector<2x1xf32>
    %c0_16 = arith.constant 0 : index
    %c0_17 = arith.constant 0 : index
    %25 = vector.load %arg8[%c0_16, %c0_17] : memref<2x1xf32, #tpu.memory_space<vmem>>, vector<2x1xf32>
    tpu.vector_store %arg8[%c0_16, %c0_17], %24 {strides = array<i32>} : memref<2x1xf32, #tpu.memory_space<vmem>>, vector<2x1xf32>,
    %c0_18 = arith.constant 0 : index
    %c0_19 = arith.constant 0 : index
    %26 = vector.load %arg7[%c0_18, %c0_19] : memref<2x1xf32, #tpu.memory_space<vmem>>, vector<2x1xf32>
    tpu.vector_store %arg7[%c0_18, %c0_19], %13 {strides = array<i32>} : memref<2x1xf32, #tpu.memory_space<vmem>>, vector<2x1xf32>,
    %c3_i32 = arith.constant 3 : i32
    %27 = arith.cmpi eq, %arg1, %c3_i32 : i32
    %28 = arith.extui %27 : i1 to i32
    %c0_i32_20 = arith.constant 0 : i32
    %29 = arith.cmpi ne, %28, %c0_i32_20 : i32
    scf.if %29 {
      %c0_21 = arith.constant 0 : index
      %c0_22 = arith.constant 0 : index
      %30 = vector.load %arg7[%c0_21, %c0_22] : memref<2x1xf32, #tpu.memory_space<vmem>>, vector<2x1xf32>
      %c0_23 = arith.constant 0 : index
      %c0_24 = arith.constant 0 : index
      %31 = vector.load %arg8[%c0_23, %c0_24] : memref<2x1xf32, #tpu.memory_space<vmem>>, vector<2x1xf32>
      %32 = math.log %31 : vector<2x1xf32>
      %33 = arith.addf %30, %32 : vector<2x1xf32>
      %34 = vector.shape_cast %33 : vector<2x1xf32> to vector<1x2x1xf32>
      %c0_25 = arith.constant 0 : index
      %c0_26 = arith.constant 0 : index
      %c0_27 = arith.constant 0 : index
      %35 = vector.load %arg6[%c0_25, %c0_26, %c0_27] : memref<1x2x1xf32, #tpu.memory_space<vmem>>, vector<1x2x1xf32>
      tpu.vector_store %arg6[%c0_25, %c0_26, %c0_27], %34 {strides = array<i32>} : memref<1x2x1xf32, #tpu.memory_space<vmem>>, vector<1x2x1xf32>,
    } else {
    }
    return
  }
  func.func @transform_0(%arg0: i32, %arg1: i32) -> (i32, i32) {
    %c0_i32 = arith.constant 0 : i32
    %c0_i32_0 = arith.constant 0 : i32
    %c0_i32_1 = arith.constant 0 : i32
    return %c0_i32, %c0_i32_0 : i32, i32
  }
  func.func @transform_1(%arg0: i32, %arg1: i32) -> (i32, i32) {
    %c4_i32 = arith.constant 4 : i32
    %0 = arith.muli %arg0, %c4_i32 : i32
    %1 = arith.addi %0, %arg1 : i32
    %c0_i32 = arith.constant 0 : i32
    %c0_i32_0 = arith.constant 0 : i32
    return %c0_i32, %1 : i32, i32
  }
  func.func @transform_2(%arg0: i32, %arg1: i32) -> (i32, i32) {
    %c4_i32 = arith.constant 4 : i32
    %0 = arith.muli %arg0, %c4_i32 : i32
    %1 = arith.addi %0, %arg1 : i32
    %c0_i32 = arith.constant 0 : i32
    %c0_i32_0 = arith.constant 0 : i32
    return %c0_i32, %1 : i32, i32
  }
  func.func @transform_3(%arg0: i32, %arg1: i32) -> (i32, i32) {
    %c4_i32 = arith.constant 4 : i32
    %0 = arith.muli %arg0, %c4_i32 : i32
    %1 = arith.addi %0, %arg1 : i32
    %c0_i32 = arith.constant 0 : i32
    %c0_i32_0 = arith.constant 0 : i32
    return %c0_i32, %1 : i32, i32
  }
  func.func @transform_4(%arg0: i32, %arg1: i32) -> (i32, i32, i32) {
    %c0_i32 = arith.constant 0 : i32
    %c0_i32_0 = arith.constant 0 : i32
    %c0_i32_1 = arith.constant 0 : i32
    return %arg0, %c0_i32, %c0_i32_0 : i32, i32, i32
  }
}

</mosaic_0001>

<bundles_post_ra>
// kernel: tpu_custom_call.1
= control target key start
LH: loop header
LB: loop body
LE: loop exit
PB: predicated region body
PF: predicated region fallthrough
CT: control target
= control target key end

     0   :  { %s1448_s0 = inlined_call_operand.hbm [shape: bf16[2,256], index: 0, kind: input, shape index: {}]   ;;  %s1449_s1 = inlined_call_operand.hbm [shape: bf16[256,1024], index: 1, kind: input, shape index: {}]   ;;  %s1450_s2 = inlined_call_operand.hbm [shape: f32[1,1024], index: 2, kind: input, shape index: {}]   ;;  %s1451_s3 = inlined_call_operand.hbm [shape: f32[2,1024], index: 3, kind: output, shape index: {0}]   ;;  %s1452_s4 = inlined_call_operand.vmem [shape: f32[2,2,1], index: 4, kind: output, shape index: {1}]  }
   0x1   :  { %1461 = sst [smem:[#allocation17_spill]] %s1449_s1 }
   0x2   :  { %1462 = sst [smem:[#allocation18_spill]] %s1450_s2 }
   0x3   :  { %10 = vsyncpa [#allocation5], 0 }
   0x4   :  { %11 = vsyncpa [#allocation8], 0 }
   0x5   :  { %13 = vsyncpa [#allocation8 + $0x1], 0 }
   0x6   :  { %14 = vsyncpa [#allocation6], 0 }
   0x7   :  { %16 = vsyncpa [#allocation6 + $0x1], 0  ;;  %s1133_s15 = smov 0   ;;  %s1135_s16 = smov 0  }
   0x8   :  { %s1137_s17 = smov 0   ;;  %s1139_s18 = smov 0  }
   0x9   :  { %s1141_s19 = smov 0   ;;  %s1143_s20 = smov 0  }
   0xa   :  { %s1145_s21 = smov 0   ;;  %s1147_s22 = smov 0  }
   0xb LB: > { %1463 = sst [smem:[#allocation14_spill]] %s1091_s21  ;;  %s31_s23 = sadd.s32 1, %s1087_s20  ;;  %s1095_s22 = sphi %s1147_s22, %s22_s22   ;;  %s1091_s21 = sphi %s1145_s21, %s1484_s21   ;;  %s1087_s20 = sphi %s1143_s20, %s1489_s20   ;;  %s1083_s19 = sphi %s1141_s19, %s1482_s19   ;;  %s1079_s18 = sphi %s1139_s18, %s1488_s18   ;;  %s1075_s17 = sphi %s1137_s17, %s1487_s17   ;;  %s1071_s16 = sphi %s1135_s16, %s1486_s16   ;;  %s1067_s15 = sphi %s1133_s15, %s1485_s15  }
   0xc   : > { %s34_s24 = sadd.s32 1, %s1091_s21  ;;  %p32_p0 = scmp.ge.s32.totalorder %s31_s23, 4 }
   0xd   : > { %s715_s25 = sshll.u32 %s1091_s21, 2  ;;  %s66_s27 = sadd.s32 1, %s1075_s17 }
   0xe   : > { %s1177_s26 = sadd.s32 %s1087_s20, %s715_s25  ;;  %s1491_s23 = smov (%p32_p0, %s31_s23), 0 }
   0xf   : > { %1464 = sst [smem:[#allocation15_spill]] %s1491_s23  ;;  %s1493_s24 = smov (!%p32_p0, %s34_s24), %s1091_s21 }
  0x10   : > { %p73_p1 = scmp.ne.s32.totalorder %s1075_s17, %s1071_s16  ;;  %p74_p2 = scmp.eq.s32.totalorder %s1095_s22, 0 }
  0x11   : > { %p36_p3 = scmp.ge.s32.totalorder %s1493_s24, 2  ;;  %p807_p5 = scmp.lt.s32.totalorder %s1095_s22, 8 }
  0x12   : > { %p1189_p4 = por %p74_p2, %p73_p1  ;;  %s200_s29 = sand.u32 1, %s1095_s22  }
  0x13   : > { %s1495_s24 = smov (%p36_p3, %s1493_s24), 0  ;;  %s202_s30 = sand.u32 1, %s1075_s17  }
  0x14   : > { %1466 = sst [smem:[#allocation16_spill]] %s1495_s24  ;;  %s716_s5 = sshll.u32 %s1495_s24, 2 }
  0x15   : > { %s62_s6 = sadd.s32 %s716_s5, %s1491_s23  ;;  %s724_s7 = sshll.u32 %s202_s30, 7 }
  0x16   : > { %s63_s8 = ssub.s32 %s1177_s26, %s62_s6  ;;  %s726_s9 = sshll.u32 %s1177_s26, 6 }
  0x17   : > { %p64_p6 = scmp.eq.s32.totalorder %s63_s8, 0  ;;  %s1467_s1 = sld [smem:[#allocation17_spill]] }
  0x18   : > { %s204_s13 = scalar_lea.vmem [#allocation7], %s724_s7  ;;  %p1218_p7 = pnand %p807_p5, %p1189_p4 }
  0x19   : > { %s212_s14 = sshll.u32 %s204_s13, 4  ;;  %s1222_s6 = scalar_lea.sflag [#allocation8], %s200_s29  ;;  %s1212_s14 = int_to_ptr.vmem [resolvable:$true] %s212_s14 }
  0x1a   : > { %s1210_s25 = scalar_select %p64_p6, %s1075_s17, %s66_s27  }
  0x1b   : > { %p907_p9 = pneg %p1218_p7 }
  0x1d   : > { %s1207_s12 = scalar_lea.hbm %s1467_s1, %s726_s9  ;;  %s910_s28 = scalar_lea.hbm %s1467_s1, 16384 }
  0x1e   : > { %s905_s8 = scalar_lea.hbm %s1207_s12, 2048  ;;  %p911_p12 = scmp.lt.u32.totalorder %s1207_s12, %s1467_s1 }
  0x1f   : > { %p906_p8 = scmp.ne.s32.totalorder %s1207_s12, %s905_s8  ;;  %p912_p13 = scmp.lt.u32.totalorder %s910_s28, %s905_s8 }
  0x20   : > { %p914_p2 = scmp.lt.u32.totalorder %s905_s8, %s1207_s12 }
  0x21   : > { %p908_p10 = pnand %p907_p9, %p906_p8  ;;  %p913_p0 = por %p912_p13, %p911_p12 }
  0x23   : > { %p909_p11 = pneg %p908_p10  ;;  %p915_p3 = por %p914_p2, %p913_p0 }
  0x25   : > { %p916_p4 = pnand %p915_p3, %p909_p11 }
  0x27   : > { %919 = shalt.err (!%p916_p4)
}
  0x28   : > { %s920_s29 = scalar_lea.vmem %s1212_s14, 2048  ;;  %s1097_s11 = smov [#allocation7]  }
  0x29   : > { %p921_p5 = scmp.ne.s32.totalorder %s1212_s14, %s920_s29  ;;  %s925_s13 = sshll.u32 %s1097_s11, 4  ;;  %s926_s13 = int_to_ptr.vmem [resolvable:$false] %s925_s13 }
  0x2a   : > { %s927_s27 = scalar_lea.vmem %s926_s13, 4096  ;;  %p928_p10 = scmp.lt.s32.totalorder %s1212_s14, %s926_s13 }
  0x2b   : > { %p923_p6 = pnand %p921_p5, %p907_p9  ;;  %p929_p12 = scmp.lt.s32.totalorder %s927_s27, %s920_s29 }
  0x2d   : > { %p924_p8 = pneg %p923_p6  ;;  %p930_p13 = por %p929_p12, %p928_p10 }
  0x2f   : > { %p931_p0 = pnand %p930_p13, %p924_p8 }
  0x31   : > { %934 = shalt.err (!%p931_p0)
}
  0x32   : > { %s1098_s8 = smov 512   ;;  %s1099_s7 = smov 64  }
  0x33   : > { %s1100_s28 = smov 4   ;;  %s1251_s9 = sadd.s32 4294967295, %s1095_s22  }
  0x34   : > { %798 = dma.hbm_to_vmem [thread:$0]  (!%p1218_p7), %s1207_s12, 2048, %s1212_s14, %s1222_s6, %s1098_s8, %s1099_s7, %s1100_s28  }
  0x35   : > { %s714_s10 = sadd.s32 4294967294, %s1095_s22   ;;  %p79_p11 = scmp.ne.s32.totalorder %s1071_s16, %s1067_s15 }
  0x36   : > { %p1456_p2 = scmp.eq.s32.totalorder %s1251_s9, 0  ;;  %p137_p3 = scmp.eq.s32.totalorder %s1251_s9, 7 }
  0x37   : > { %p143_p4 = scmp.eq.s32.totalorder %s714_s10, 7  ;;  %p721_p6 = scmp.ge.s32.totalorder %s1095_s22, 1 }
  0x38   : > { %p1260_p5 = por %p1456_p2, %p79_p11  ;;  %p1268_p8 = por %p137_p3, %p73_p1 }
  0x39   : > { %p1272_p10 = por %p143_p4, %p79_p11  ;;  %p176_p12 = scmp.lt.s32.totalorder %s1095_s22, 9 }
  0x3a   : > { %s1469_s29 = scalar_select %p1260_p5, 1, 0 }
  0x3b   : > { %s1470_s12 = scalar_select %p1268_p8, 1, 0 }
  0x3c   : > { %s1471_s14 = scalar_select %p1272_p10, 1, 0 }
  0x3d   : > { %p1277_p13 = pnand %p721_p6, %p176_p12  ;;  %s1101_s13 = smov [#allocation4]  }
  0x3e   : > { %s189_s27 = sshll.u32 %s1101_s13, 4  ;;  %s728_s8 = sshll.u32 %s1177_s26, 4  ;;  %s1289_s27 = int_to_ptr.vmem [resolvable:$true] %s189_s27 }
  0x3f   : > { %s1472_s11 = scalar_select %p1277_p13, 1, 0 }
  0x40   : > { %p791_p0 = pneg %p1277_p13  ;;  %s1473_s2 = sld [smem:[#allocation18_spill]] }
  0x41   : > { %s225_s1 = scalar_lea.vmem [#allocation9], %s202_s30 }
  0x42   : > { %s234_s24 = sshll.u32 %s225_s1, 4  ;;  %p1295_p1 = pnand %p791_p0, %p1456_p2  ;;  %s235_s24 = int_to_ptr.vmem [resolvable:$true] %s234_s24 }
  0x44   : > { %s1474_s13 = scalar_select %p1295_p1, 1, 0 }
  0x46   : > { %s1287_s10 = scalar_lea.hbm %s1473_s2, %s728_s8  ;;  %s940_s28 = scalar_lea.hbm %s1473_s2, 128 }
  0x47   : > { %s935_s26 = scalar_lea.hbm %s1287_s10, 16  ;;  %p941_p6 = scmp.lt.u32.totalorder %s1287_s10, %s1473_s2 }
  0x48   : > { %p936_p11 = scmp.ne.s32.totalorder %s1287_s10, %s935_s26  ;;  %p942_p12 = scmp.lt.u32.totalorder %s940_s28, %s935_s26 }
  0x49   : > { %p944_p2 = scmp.lt.u32.totalorder %s935_s26, %s1287_s10 }
  0x4a   : > { %p938_p3 = pnand %p936_p11, %p907_p9  ;;  %p943_p0 = por %p942_p12, %p941_p6 }
  0x4c   : > { %p939_p4 = pneg %p938_p3  ;;  %p945_p10 = por %p944_p2, %p943_p0 }
  0x4e   : > { %p946_p8 = pnand %p945_p10, %p939_p4 }
  0x50   : > { %949 = shalt.err (!%p946_p8)
}
  0x51   : > { %s950_s1 = scalar_lea.vmem %s235_s24, 16  ;;  %s1102_s30 = smov [#allocation9]  }
  0x52   : > { %p951_p5 = scmp.ne.s32.totalorder %s235_s24, %s950_s1  ;;  %s955_s8 = sshll.u32 %s1102_s30, 4  ;;  %s956_s8 = int_to_ptr.vmem [resolvable:$false] %s955_s8 }
  0x53   : > { %s957_s7 = scalar_lea.vmem %s956_s8, 32  ;;  %p958_p13 = scmp.lt.s32.totalorder %s235_s24, %s956_s8 }
  0x54   : > { %p953_p11 = pnand %p951_p5, %p907_p9  ;;  %p959_p1 = scmp.lt.s32.totalorder %s957_s7, %s950_s1 }
  0x56   : > { %p954_p3 = pneg %p953_p11  ;;  %p960_p6 = por %p959_p1, %p958_p13 }
  0x58   : > { %p961_p12 = pnand %p960_p6, %p954_p3 }
  0x5a   : > { %964 = shalt.err (!%p961_p12)
}
  0x5b   : > { %801 = dma.hbm_to_vmem [thread:$0]  (!%p1218_p7), %s1287_s10, 16, %s235_s24, %s1222_s6  }
  0x5c   : > { %s965_s26 = scalar_lea.hbm %s1448_s0, 32  ;;  %p1475_p2 = scmp.ne.s32.totalorder %s1474_s13, 0 }
  0x5d   : > { %p966_p9 = scmp.ne.s32.totalorder %s1448_s0, %s965_s26  ;;  %p972_p13 = scmp.lt.u32.totalorder %s965_s26, %s1448_s0 }
  0x5e   : > { %p967_p5 = pneg %p1475_p2 }
  0x60   : > { %p968_p8 = pnand %p967_p5, %p966_p9 }
  0x62   : > { %p969_p10 = pneg %p968_p8 }
  0x64   : > { %p974_p1 = pnand %p972_p13, %p969_p10 }
  0x66   : > { %977 = shalt.err (!%p974_p1)
}
  0x67   : > { %s978_s24 = scalar_lea.vmem %s1289_s27, 32  ;;  %p986_p11 = scmp.lt.s32.totalorder %s1289_s27, %s1289_s27 }
  0x68   : > { %p979_p7 = scmp.ne.s32.totalorder %s1289_s27, %s978_s24  ;;  %p987_p3 = scmp.lt.s32.totalorder %s978_s24, %s978_s24 }
  0x6a   : > { %p981_p4 = pnand %p979_p7, %p967_p5  ;;  %p988_p6 = por %p987_p3, %p986_p11 }
  0x6c   : > { %p982_p0 = pneg %p981_p4 }
  0x6e   : > { %p989_p12 = pnand %p988_p6, %p982_p0 }
  0x70   : > { %992 = shalt.err (!%p989_p12)
}
  0x71   : > { %794 = dma.hbm_to_vmem [thread:$0]  (!%p1475_p2), %s1448_s0, 32, %s1289_s27, [#allocation5]  }
  0x72   : > { %p1476_p9 = scmp.ne.s32.totalorder %s1472_s11, 0 }
  0x73   : > { %p1477_p8 = scmp.eq.s32.totalorder (!%p1476_p9), %s1251_s9, 0 }
  0x74   : > { %243 = sbr.rel (%p1476_p9) target bundleno = 874 (0x36a), region = 32 }
  0x7b   : > { %1054 = dma.done.wait (%p1477_p8), [#allocation5], 32   ;;  %p1478_p5 = pmov %p1477_p8 }
  0x7c   : > { %s249_s6 = sand.u32 1, %s1251_s9   ;;  %s1348_s10 = sand.u32 1, %s1071_s16  }
  0x7d   : > { %1056 = vsyncadd (%p1478_p5), [#allocation5], 4294967264  ;;  %s731_s13 = sshll.u32 %s1348_s10, 7  ;;  %s250_s8 = scalar_lea.sflag [#allocation8], %s249_s6 }
  0x7e   : > { %s1351_s7 = scalar_lea.vmem [#allocation7], %s731_s13  ;;  %p1479_p2 = scmp.ne.s32.totalorder %s1469_s29, 0 }
  0x80   : > { %1058 = dma.done.wait (%p1479_p2), %s250_s8, 2064  }
  0x81   : > { %1060 = vsyncadd (%p1479_p2), %s250_s8, 4294965232  ;;  %s732_s11 = sshll.u32 %s1348_s10, 1  ;;  %p300_p10 = scmp.lt.s32.totalorder %s1083_s19, 1 }
  0x82   : > { %s261_s28 = scalar_lea.vmem [#allocation9], %s1348_s10  ;;  %s1366_s1 = scalar_lea.vmem [#allocation10], %s732_s11 }
  0x83   : > { %s301_s27 = scalar_select %p300_p10, %s1083_s19, 1 }
  0x84   : > { %p734_p13 = scmp.ne.s32.totalorder %s1079_s18, 0 }
  0x85   : > { %s733_s9 = sshll.u32 %s301_s27, 1  ;;  %vm309_vm0 = vcmask (!%p734_p13), 1024   ;;  %v1103_v0 = vmov (!%p734_p13), -inf   ;;  %v1104_v1 = vmov (!%p734_p13), 0.0  }
  0x86   : > { %s1363_s26 = scalar_lea.vmem %s1452_s4, %s733_s9  ;;  %308 = sbr.rel (%p734_p13) target bundleno = 141 (0x8d), region = 48  ;;  %310 = vst.msk [vmem:[#allocation2] sm:$0x3] (!%p734_p13), %vm309_vm0, %v1103_v0  ;;  %311 = vst.msk [vmem:[#allocation3] sm:$0x3] (!%p734_p13), %vm309_vm0, %v1104_v1 }
  0x8d PF: > { %v883_v2 = vld [vmem:[%s1351_s7 + $0x40] sm:$0xff]   ;;  %v885_v4 = vld [vmem:[%s1351_s7 + $0x48] sm:$0xff]   ;;  %v887_v6 = vld [vmem:[%s1351_s7 + $0x50] sm:$0xff]   ;;  %v364_v11 = vlaneseq  ;;  %v1105_v15 = vmov 1966171168   ;;  %vm514_vm1 = vcmask 1041408  }
  0x8e   : > { %v884_v3 = vld [vmem:[%s1351_s7] sm:$0xff]   ;;  %759 = vmatprep.subr.bf16.mxu0 %v883_v2  ;;  %v886_v5 = vld [vmem:[%s1351_s7 + $0x8] sm:$0xff]   ;;  %v888_v7 = vld [vmem:[%s1351_s7 + $0x10] sm:$0xff]   ;;  %v362_v16 = vunpack.c.l.s4 %v1105_v15  ;;  %v1106_v36 = vmov 0   ;;  %vm537_vm2 = vcmask 1024   ;;  %p753_p1 = scmp.ne.s32.totalorder %s1079_s18, 3 }
  0x8f   : > { %760 = vmatpush3.bf16.msra.mxu0 %v884_v3  ;;  %v889_v8 = vld [vmem:[%s1351_s7 + $0x58] sm:$0xff]   ;;  %v891_v10 = vld [vmem:[%s1351_s7 + $0x60] sm:$0xff]   ;;  %v893_v13 = vld [vmem:[%s1351_s7 + $0x68] sm:$0xff]   ;;  %v365_v17 = vshrl.u32 %v364_v11, 7  ;;  %882 = vset.pattern.permute.xlu0 %v1106_v36 }
  0x90   : > { %761 = vmatprep.subr.bf16.mxu0 %v885_v4  ;;  %v890_v9 = vld [vmem:[%s1351_s7 + $0x18] sm:$0xff]   ;;  %v892_v12 = vld [vmem:[%s1351_s7 + $0x20] sm:$0xff]   ;;  %v894_v18 = vld [vmem:[%s1351_s7 + $0x28] sm:$0xff]   ;;  %v363_v20 = vunpack.c.0.s8 %v362_v16 }
  0x91   : > { %v736_v14 = vld.sshfl [vmem:[#allocation4] sm:$0x11 pattern:$0x75316420]  ;;  %v895_v21 = vld [vmem:[%s1351_s7 + $0x70] sm:$0xff]  }
  0x92   : > { %v360_v19 = vcombine.high %v736_v14, %v736_v14  ;;  %v366_v22 = vsub.s32 %v363_v20, %v365_v17  ;;  %v896_v23 = vld [vmem:[%s1351_s7 + $0x30] sm:$0xff]   ;;  %v897_v25 = vld [vmem:[%s1351_s7 + $0x78] sm:$0xff]  }
  0x93   : > { %762 = vmatpush3.bf16.msra.mxu0 %v886_v5  ;;  %v898_v26 = vld [vmem:[%s1351_s7 + $0x38] sm:$0xff]   ;;  %v735_v29 = vld [vmem:[%s261_s28] ss:$0 sm:$0xff] }
  0x94   : > { %763 = vmatprep.subr.bf16.mxu0 %v887_v6  ;;  %v374_v24 = vrot.slane %v360_v19, %v366_v22  ;;  %v367_v27 = vrot.slane %v736_v14, %v366_v22  ;;  %v518_v37 = vld [vmem:[#allocation2] sm:$0x3]  ;;  %v520_v48 = vld [vmem:[#allocation3] sm:$0x3] }
  0x96   : > { %505 = vmatprep.mubr.bf16.mxu0 %v374_v24 }
  0x97   : > { %764 = vmatpush3.bf16.msra.mxu0 %v888_v7 }
  0x98   : > { %765 = vmatprep.subr.bf16.mxu0 %v889_v8 }
  0x9b   : > { %766 = vmatpush3.bf16.msra.mxu0 %v890_v9 }
  0x9c   : > { %767 = vmatprep.subr.bf16.mxu0 %v891_v10 }
  0x9f   : > { %768 = vmatpush3.bf16.msra.mxu0 %v892_v12 }
  0xa0   : > { %769 = vmatprep.subr.bf16.mxu0 %v893_v13 }
  0xa3   : > { %770 = vmatpush3.bf16.msra.mxu0 %v894_v18 }
  0xa4   : > { %771 = vmatprep.subr.bf16.mxu0 %v895_v21 }
  0xa7   : > { %772 = vmatpush3.bf16.msra.mxu0 %v896_v23 }
  0xa8   : > { %773 = vmatprep.subr.bf16.mxu0 %v897_v25 }
  0xab   : > { %774 = vmatpush3.bf16.msra.mxu0 %v898_v26 }
  0xae   : > { %506 = vmatmul.mubr.bf16.vlgmr.msra.gmra.mrb[0].mxu0 %v367_v27 }
 0x181   : > { %v775_v28 = vpop.f32.mrb[0].mxu0 }
 0x182   : > { %v776_v30 = vpop.f32.mrb[1].mxu0 }
 0x183   : > { %v777_v31 = vadd.f32 %v776_v30, %v775_v28  ;;  %v778_v32 = vpop.f32.mrb[2].mxu0 }
 0x184   : > { %v779_v33 = vpop.f32.mrb[3].mxu0 }
 0x185   : > { %v508_v34 = vadd.f32 %v777_v31, %v735_v29 }
 0x187   : > { %513 = vst [vmem:[%s1366_s1] sm:$0x3] %v508_v34  ;;  %v515_v35 = vsel %vm514_vm1, %v508_v34, -inf }
 0x188   : > { %516 = vmax.xlane.f32.xlu0 %v515_v35 }
 0x215   : > { %v517_v38 = vpop.xlane.xlu0 %516 }
 0x216   : > { %v519_v39 = vmax.f32 %v518_v37, %v517_v38 }
 0x218   : > { %v521_v40 = vsub.f32 %v518_v37, %v519_v39  ;;  %539 = vst.msk [vmem:[#allocation2] sm:$0x3] %vm537_vm2, %v519_v39  ;;  %527 = vperm.xlu0 %882, %v519_v39  }
 0x21a   : > { %v522_v46 = vmul.f32 1.442695, %v521_v40 }
 0x21f   : > { %v544_v54 = vld [vmem:[#allocation2] sm:$0x3] (!%p753_p1) }
 0x297   : > { %v528_v41 = vpop.permute.xlu0 %527 }
 0x298   : > { %v530_v42 = vsub.f32 %v508_v34, %v528_v41 }
 0x29a   : > { %v531_v43 = vmul.f32 1.442695, %v530_v42 }
 0x29c   : > { %899 = vpow2.f32 %v531_v43 }
 0x29d   : > { %901 = vpow2.f32 %v522_v46 }
 0x2a6   : > { %v900_v44 = vpop.eup %899 }
 0x2a7   : > { %v533_v45 = vsel %vm514_vm1, %v900_v44, 0.0  ;;  %v902_v47 = vpop.eup %901 }
 0x2a8   : > { %534 = vadd.xlane.f32.xlu1 %v533_v45  ;;  %v524_v49 = vmul.f32 %v902_v47, %v520_v48 }
 0x332   : > { %543 = sbr.rel (%p753_p1) target bundleno = 848 (0x350), region = 52 }
 0x335   : > { %v535_v50 = vpop.xlane.xlu1 %534 }
 0x336   : > { %v536_v51 = vadd.f32 %v535_v50, %v524_v49 }
 0x338   : > { %538 = vst.msk [vmem:[#allocation3] sm:$0x3] %vm537_vm2, %v536_v51 }
 0x33f   : > { %v545_v52 = vld [vmem:[#allocation3] sm:$0x3] }
 0x340   : > { %903 = vlog2.f32 %v545_v52 }
 0x34a   : > { %v904_v53 = vpop.eup %903 }
 0x34b   : > { %v547_v55 = vmul.f32 0.6931472, %v904_v53 }
 0x34d   : > { %v548_v56 = vadd.f32 %v547_v55, %v544_v54 }
 0x34f   : > { %549 = vst.msk [vmem:[%s1363_s26] sm:$0x3] %vm537_vm2, %v548_v56 }
 0x350 PF: > { %s755_s29 = sshll.u32 %s1083_s19, 2  ;;  %s570_s24 = sshll.u32 %s1366_s1, 4  ;;  %s1398_s24 = int_to_ptr.vmem [resolvable:$true] %s570_s24 }
 0x351   : > { %s563_s30 = sadd.s32 %s1079_s18, %s755_s29  ;;  %s551_s8 = scalar_lea.sflag [#allocation6], %s1348_s10 }
 0x352   : > { %s756_s2 = sshll.u32 %s563_s30, 5  ;;  %s993_s7 = scalar_lea.vmem %s1398_s24, 32 }
 0x353   : > { %s568_s13 = scalar_lea.hbm %s1451_s3, %s756_s2  ;;  %p994_p7 = scmp.ne.s32.totalorder %s1398_s24, %s993_s7 }
 0x354   : > { %p1480_p4 = scmp.ne.s32.totalorder %s1470_s12, 0  ;;  %s1107_s11 = smov [#allocation10]  }
 0x355   : > { %s997_s19 = sshll.u32 %s1107_s11, 4  ;;  %s998_s19 = int_to_ptr.vmem [resolvable:$false] %s997_s19 }
 0x356   : > { %p995_p0 = pnand %p994_p7, %p1480_p4  ;;  %s999_s18 = scalar_lea.vmem %s998_s19, 64 }
 0x357   : > { %p1000_p3 = scmp.lt.s32.totalorder %s1398_s24, %s998_s19  ;;  %p1001_p6 = scmp.lt.s32.totalorder %s999_s18, %s993_s7 }
 0x358   : > { %p996_p11 = pneg %p995_p0 }
 0x359   : > { %p1002_p12 = por %p1001_p6, %p1000_p3 }
 0x35b   : > { %p1003_p9 = pnand %p1002_p12, %p996_p11 }
 0x35d   : > { %1006 = shalt.err (!%p1003_p9)
}
 0x35e   : > { %s1007_s27 = scalar_lea.hbm %s568_s13, 32  ;;  %s1011_s21 = scalar_lea.hbm %s1451_s3, 256 }
 0x35f   : > { %p1008_p8 = scmp.ne.s32.totalorder %s568_s13, %s1007_s27  ;;  %p1012_p10 = scmp.lt.u32.totalorder %s568_s13, %s1451_s3 }
 0x360   : > { %p1013_p13 = scmp.lt.u32.totalorder %s1011_s21, %s1007_s27  ;;  %p1015_p7 = scmp.lt.u32.totalorder %s1007_s27, %s568_s13 }
 0x361   : > { %p1009_p5 = pnand %p1008_p8, %p1480_p4 }
 0x362   : > { %p1014_p1 = por %p1013_p13, %p1012_p10 }
 0x363   : > { %p1010_p2 = pneg %p1009_p5 }
 0x364   : > { %p1016_p0 = por %p1015_p7, %p1014_p1 }
 0x366   : > { %p1017_p11 = pnand %p1016_p0, %p1010_p2 }
 0x368   : > { %1020 = shalt.err (!%p1017_p11)
}
 0x369   : > { %789 = dma.vmem_to_hbm [thread:$0]  (%p1480_p4), %s1398_s24, 32, %s568_s13, %s551_s8  }
 0x36a PF: > { %p809_p3 = scmp.ge.s32.totalorder %s1095_s22, 2  ;;  %s585_s28 = sand.u32 1, %s1067_s15  }
 0x36b   : > { %p1481_p6 = scmp.ne.s32.totalorder %s1471_s14, 0  ;;  %s586_s1 = scalar_lea.sflag [#allocation6], %s585_s28 }
 0x36d   : > { %p803_p12 = pnand %p809_p3, %p1481_p6 }
 0x36f   : > { %1062 = dma.done.wait (!%p803_p12), %s586_s1, 32  }
 0x370   : > { %1064 = vsyncadd (!%p803_p12), %s586_s1, 4294967264  ;;  %s22_s22 = sadd.s32 1, %s1095_s22   ;;  %s1482_s19 = sld [smem:[#allocation14_spill]] }
 0x371   : > { %p19_p9 = scmp.ge.s32.totalorder %s22_s22, 10   ;;  %s1483_s12 = sld [smem:[#allocation15_spill]] }
 0x372   : > { %s1484_s21 = sld [smem:[#allocation16_spill]]  ;;  %s1485_s15 = smov %s1071_s16 }
 0x373   : > { %s1486_s16 = smov %s1075_s17  ;;  %s1487_s17 = smov %s1210_s25 }
 0x374   : > { %s1488_s18 = smov %s1087_s20  ;;  %21 = sbr.rel (!%p19_p9) target bundleno = 11 (0xb), region = 113 }
 0x377   : > { %s1489_s20 = smov %s1483_s12 }
 0x37b   :  { %598 = vsyncpa [#allocation5], 1 }
 0x37c   :  { %600 = vsyncpa [#allocation5 + $0x1], 1 }
 0x37d   :  { %601 = vsyncpa [#allocation8], 1 }
 0x37e   :  { %603 = vsyncpa [#allocation8 + $0x1], 1 }
 0x37f   :  { %604 = vsyncpa [#allocation6], 1 }
 0x380   :  { %606 = vsyncpa [#allocation6 + $0x1], 1 }

</bundles_post_ra>
